<compile_context>
chip_gen: v6e
topology: v6e:2x2x1
jax: 0.10.0
libtpu: 0.0.40
codegen_flags: <defaults>
</compile_context>

<pallas_src>
import jax
import jax.numpy as jnp
from jax.experimental import pallas as pl
from jax.experimental.pallas import tpu as pltpu


def _round_up(x, m):
    return ((x + m - 1) // m) * m


def generator_kernel(x_ref, w1_ref, b1_ref, w2_ref, b2_ref, w3_ref, b3_ref, o_ref):
    """Fused 3-layer MLP on one (BM, in_dim) row tile.

    Matmuls hit the MXU with f32 accumulation; bias-add + ReLU run on the VPU
    in f32; activations are cast back to bf16 only as MXU inputs.
    """
    x = x_ref[...]  # bf16 (BM, in_dim)

    h1 = jnp.dot(x, w1_ref[...], preferred_element_type=jnp.float32) + b1_ref[...]
    h1 = jnp.maximum(h1, 0.0).astype(w2_ref.dtype)

    h2 = jnp.dot(h1, w2_ref[...], preferred_element_type=jnp.float32) + b2_ref[...]
    h2 = jnp.maximum(h2, 0.0).astype(w3_ref.dtype)

    out = jnp.dot(h2, w3_ref[...], preferred_element_type=jnp.float32) + b3_ref[...]
    o_ref[...] = out.astype(o_ref.dtype)


def generator_forward(x, params, *, block_m=512, compute_dtype=jnp.bfloat16):
    """Run the generator MLP. x: (B, input_dim) f32. Returns (B, output_dim) f32."""
    w1, b1, w2, b2, w3, b3 = params
    B, in_dim = x.shape
    h1_dim = w1.shape[1]
    h2_dim = w2.shape[1]
    out_dim = w3.shape[1]

    # --- lane-dense output: pad out_dim up to a multiple of 128 lanes -------
    out_pad = _round_up(out_dim, 128)
    if out_pad != out_dim:
        w3 = jnp.pad(w3, ((0, 0), (0, out_pad - out_dim)))
        b3 = jnp.pad(b3, ((0, 0), (0, out_pad - out_dim)))

    # --- batch tiling: big row tiles when possible, single tile otherwise ---
    if B >= block_m:
        bm = block_m
        b_pad = _round_up(B, bm)
    else:
        b_pad = _round_up(B, 8)   # sublane alignment
        bm = b_pad                # single grid step for tiny batches
    if b_pad != B:
        x = jnp.pad(x, ((0, b_pad - B), (0, 0)))
    grid = (b_pad // bm,)

    # --- dtypes: bf16 inputs/weights, f32 biases and accumulation -----------
    x = x.astype(compute_dtype)
    w1 = w1.astype(compute_dtype)
    w2 = w2.astype(compute_dtype)
    w3 = w3.astype(compute_dtype)
    b1 = b1.astype(jnp.float32)
    b2 = b2.astype(jnp.float32)
    b3 = b3.astype(jnp.float32)

    # --- cost hint so XLA schedules / overlaps around the custom call -------
    flops = 2 * b_pad * (in_dim * h1_dim + h1_dim * h2_dim + h2_dim * out_pad)
    bytes_accessed = (
        b_pad * in_dim * 2                              # x in (bf16)
        + (in_dim * h1_dim + h1_dim * h2_dim + h2_dim * out_pad) * 2  # weights (bf16)
        + (h1_dim + h2_dim + out_pad) * 4               # biases (f32)
        + b_pad * out_pad * 4                           # out (f32)
    )
    cost = pl.CostEstimate(flops=flops, transcendentals=0,
                           bytes_accessed=bytes_accessed)

    # Weights/biases: full-array blocks with constant index_maps -> fetched
    # once into VMEM (default space for blocked specs) and kept resident.
    def resident(arr):
        return pl.BlockSpec(arr.shape, lambda i: (0, 0))

    out = pl.pallas_call(
        generator_kernel,
        out_shape=jax.ShapeDtypeStruct((b_pad, out_pad), jnp.float32),
        grid=grid,
        in_specs=[
            pl.BlockSpec((bm, in_dim), lambda i: (i, 0)),   # x: tiled over batch
            resident(w1), resident(b1),
            resident(w2), resident(b2),
            resident(w3), resident(b3),
        ],
        out_specs=pl.BlockSpec((bm, out_pad), lambda i: (i, 0)),
        compiler_params=pltpu.CompilerParams(
            dimension_semantics=("parallel",),   # megacore sharding on v7x
        ),
        cost_estimate=cost,
    )(x, w1, b1, w2, b2, w3, b3)

    return out[:B, :out_dim]


def init_params(key, input_dim, output_dim):
    """Deterministic init mimicking PyTorch nn.Linear default (uniform +-1/sqrt(fan_in))."""
    dims = [(input_dim, 128), (128, 256), (256, output_dim)]
    params = []
    for (fan_in, fan_out) in dims:
        key, kw, kb = jax.random.split(key, 3)
        bound = 1.0 / jnp.sqrt(fan_in)
        w = jax.random.uniform(kw, (fan_in, fan_out), jnp.float32, -bound, bound)
        b = jax.random.uniform(kb, (1, fan_out), jnp.float32, -bound, bound)
        params += [w, b]
    return tuple(params)


def reference_forward(x, params):
    w1, b1, w2, b2, w3, b3 = params
    h1 = jnp.maximum(x @ w1 + b1, 0.0)
    h2 = jnp.maximum(h1 @ w2 + b2, 0.0)
    return h2 @ w3 + b3


if __name__ == "__main__":
    key = jax.random.PRNGKey(0)
    batch, input_dim, output_dim = 8, 32, 64

    key, kx = jax.random.split(key)
    x = jax.random.normal(kx, (batch, input_dim), jnp.float32)
    params = init_params(key, input_dim, output_dim)

    # Small-batch path (single grid step, batch padded to a sublane multiple).
    out = jax.block_until_ready(generator_forward(x, params))
    ref = reference_forward(x, params)
    assert out.shape == (batch, output_dim)
    # bf16 inputs/weights with f32 accumulation -> loosened tolerance.
    assert jnp.allclose(out, ref, atol=3e-2, rtol=3e-2), "mismatch vs pure-JAX reference (small batch)"

    # Larger batch exercises the gridded / pipelined / megacore path (grid = 2 steps).
    big_batch = 1024
    key, kb = jax.random.split(key)
    xb = jax.random.normal(kb, (big_batch, input_dim), jnp.float32)
    outb = jax.block_until_ready(generator_forward(xb, params, block_m=512))
    refb = reference_forward(xb, params)
    assert outb.shape == (big_batch, output_dim)
    assert jnp.allclose(outb, refb, atol=3e-2, rtol=3e-2), "mismatch vs pure-JAX reference (large batch)"

    print("KERNEL_OK")
</pallas_src>

<mosaic_0001>
module attributes {stable_mosaic.version = 11 : i64} {
  func.func @generator_kernel(%arg0: i32, %arg1: memref<8x32xbf16, #tpu.memory_space<vmem>>, %arg2: memref<32x128xbf16, #tpu.memory_space<vmem>>, %arg3: memref<1x128xf32, #tpu.memory_space<vmem>>, %arg4: memref<128x256xbf16, #tpu.memory_space<vmem>>, %arg5: memref<1x256xf32, #tpu.memory_space<vmem>>, %arg6: memref<256x128xbf16, #tpu.memory_space<vmem>>, %arg7: memref<1x128xf32, #tpu.memory_space<vmem>>, %arg8: memref<8x128xf32, #tpu.memory_space<vmem>>) attributes {dimension_semantics = [#tpu.dimension_semantics<parallel>], iteration_bounds = array<i64: 1>, scalar_prefetch = 0 : i64, scratch_operands = 0 : i64, tpu.core_type = #tpu.core_type<tc>, window_params = [{transform_indices = @transform_0, window_bounds = array<i64: 8, 32>}, {pipeline_mode = #tpu.pipeline_mode<synchronous>, transform_indices = @transform_1, window_bounds = array<i64: 32, 128>}, {pipeline_mode = #tpu.pipeline_mode<synchronous>, transform_indices = @transform_2, window_bounds = array<i64: 1, 128>}, {pipeline_mode = #tpu.pipeline_mode<synchronous>, transform_indices = @transform_3, window_bounds = array<i64: 128, 256>}, {pipeline_mode = #tpu.pipeline_mode<synchronous>, transform_indices = @transform_4, window_bounds = array<i64: 1, 256>}, {pipeline_mode = #tpu.pipeline_mode<synchronous>, transform_indices = @transform_5, window_bounds = array<i64: 256, 128>}, {pipeline_mode = #tpu.pipeline_mode<synchronous>, transform_indices = @transform_6, window_bounds = array<i64: 1, 128>}, {transform_indices = @transform_7, window_bounds = array<i64: 8, 128>}]} {
    %c0 = arith.constant 0 : index
    %c0_0 = arith.constant 0 : index
    %0 = vector.load %arg1[%c0, %c0_0] : memref<8x32xbf16, #tpu.memory_space<vmem>>, vector<8x32xbf16>
    %c0_1 = arith.constant 0 : index
    %c0_2 = arith.constant 0 : index
    %1 = vector.load %arg2[%c0_1, %c0_2] : memref<32x128xbf16, #tpu.memory_space<vmem>>, vector<32x128xbf16>
    %cst = arith.constant dense<0.000000e+00> : vector<8x128xf32>
    %2 = tpu.matmul %0, %1, %cst {dimension_numbers = #tpu.dot_dimension_numbers<[1], [0], [0], [1], [0, 0, 1, 1], [], []>} : vector<8x32xbf16>, vector<32x128xbf16>, vector<8x128xf32> -> vector<8x128xf32>
    %c0_3 = arith.constant 0 : index
    %c0_4 = arith.constant 0 : index
    %3 = vector.load %arg3[%c0_3, %c0_4] : memref<1x128xf32, #tpu.memory_space<vmem>>, vector<1x128xf32>
    %4 = vector.broadcast %3 : vector<1x128xf32> to vector<8x128xf32>
    %5 = arith.addf %2, %4 : vector<8x128xf32>
    %cst_5 = arith.constant 0.000000e+00 : f32
    %6 = vector.broadcast %cst_5 : f32 to vector<8x128xf32>
    %7 = arith.maximumf %5, %6 : vector<8x128xf32>
    %8 = arith.truncf %7 : vector<8x128xf32> to vector<8x128xbf16>
    %c0_6 = arith.constant 0 : index
    %c0_7 = arith.constant 0 : index
    %9 = vector.load %arg4[%c0_6, %c0_7] : memref<128x256xbf16, #tpu.memory_space<vmem>>, vector<128x256xbf16>
    %cst_8 = arith.constant dense<0.000000e+00> : vector<8x256xf32>
    %10 = tpu.matmul %8, %9, %cst_8 {dimension_numbers = #tpu.dot_dimension_numbers<[1], [0], [0], [1], [0, 0, 1, 1], [], []>} : vector<8x128xbf16>, vector<128x256xbf16>, vector<8x256xf32> -> vector<8x256xf32>
    %c0_9 = arith.constant 0 : index
    %c0_10 = arith.constant 0 : index
    %11 = vector.load %arg5[%c0_9, %c0_10] : memref<1x256xf32, #tpu.memory_space<vmem>>, vector<1x256xf32>
    %12 = vector.broadcast %11 : vector<1x256xf32> to vector<8x256xf32>
    %13 = arith.addf %10, %12 : vector<8x256xf32>
    %cst_11 = arith.constant 0.000000e+00 : f32
    %14 = vector.broadcast %cst_11 : f32 to vector<8x256xf32>
    %15 = arith.maximumf %13, %14 : vector<8x256xf32>
    %16 = arith.truncf %15 : vector<8x256xf32> to vector<8x256xbf16>
    %c0_12 = arith.constant 0 : index
    %c0_13 = arith.constant 0 : index
    %17 = vector.load %arg6[%c0_12, %c0_13] : memref<256x128xbf16, #tpu.memory_space<vmem>>, vector<256x128xbf16>
    %cst_14 = arith.constant dense<0.000000e+00> : vector<8x128xf32>
    %18 = tpu.matmul %16, %17, %cst_14 {dimension_numbers = #tpu.dot_dimension_numbers<[1], [0], [0], [1], [0, 0, 1, 1], [], []>} : vector<8x256xbf16>, vector<256x128xbf16>, vector<8x128xf32> -> vector<8x128xf32>
    %c0_15 = arith.constant 0 : index
    %c0_16 = arith.constant 0 : index
    %19 = vector.load %arg7[%c0_15, %c0_16] : memref<1x128xf32, #tpu.memory_space<vmem>>, vector<1x128xf32>
    %20 = vector.broadcast %19 : vector<1x128xf32> to vector<8x128xf32>
    %21 = arith.addf %18, %20 : vector<8x128xf32>
    %c0_17 = arith.constant 0 : index
    %c0_18 = arith.constant 0 : index
    %22 = vector.load %arg8[%c0_17, %c0_18] : memref<8x128xf32, #tpu.memory_space<vmem>>, vector<8x128xf32>
    tpu.vector_store %arg8[%c0_17, %c0_18], %21 {strides = array<i32>} : memref<8x128xf32, #tpu.memory_space<vmem>>, vector<8x128xf32>,
    return
  }
  func.func @transform_0(%arg0: i32) -> (i32, i32) {
    %c0_i32 = arith.constant 0 : i32
    %c0_i32_0 = arith.constant 0 : i32
    return %arg0, %c0_i32 : i32, i32
  }
  func.func @transform_1(%arg0: i32) -> (i32, i32) {
    %c0_i32 = arith.constant 0 : i32
    %c0_i32_0 = arith.constant 0 : i32
    %c0_i32_1 = arith.constant 0 : i32
    return %c0_i32, %c0_i32_0 : i32, i32
  }
  func.func @transform_2(%arg0: i32) -> (i32, i32) {
    %c0_i32 = arith.constant 0 : i32
    %c0_i32_0 = arith.constant 0 : i32
    %c0_i32_1 = arith.constant 0 : i32
    return %c0_i32, %c0_i32_0 : i32, i32
  }
  func.func @transform_3(%arg0: i32) -> (i32, i32) {
    %c0_i32 = arith.constant 0 : i32
    %c0_i32_0 = arith.constant 0 : i32
    %c0_i32_1 = arith.constant 0 : i32
    return %c0_i32, %c0_i32_0 : i32, i32
  }
  func.func @transform_4(%arg0: i32) -> (i32, i32) {
    %c0_i32 = arith.constant 0 : i32
    %c0_i32_0 = arith.constant 0 : i32
    %c0_i32_1 = arith.constant 0 : i32
    return %c0_i32, %c0_i32_0 : i32, i32
  }
  func.func @transform_5(%arg0: i32) -> (i32, i32) {
    %c0_i32 = arith.constant 0 : i32
    %c0_i32_0 = arith.constant 0 : i32
    %c0_i32_1 = arith.constant 0 : i32
    return %c0_i32, %c0_i32_0 : i32, i32
  }
  func.func @transform_6(%arg0: i32) -> (i32, i32) {
    %c0_i32 = arith.constant 0 : i32
    %c0_i32_0 = arith.constant 0 : i32
    %c0_i32_1 = arith.constant 0 : i32
    return %c0_i32, %c0_i32_0 : i32, i32
  }
  func.func @transform_7(%arg0: i32) -> (i32, i32) {
    %c0_i32 = arith.constant 0 : i32
    %c0_i32_0 = arith.constant 0 : i32
    return %arg0, %c0_i32 : i32, i32
  }
}

</mosaic_0001>

<bundles_post_ra>
// kernel: tpu_custom_call.1
= control target key start
LH: loop header
LB: loop body
LE: loop exit
PB: predicated region body
PF: predicated region fallthrough
CT: control target
= control target key end

     0   :  { %12 = vsyncpa [#allocation3], 0  ;;  %s811_s0 = inlined_call_operand.hbm [shape: bf16[8,32], index: 0, kind: input, shape index: {}]   ;;  %s812_s1 = inlined_call_operand.hbm [shape: bf16[32,128], index: 1, kind: input, shape index: {}]   ;;  %s813_s2 = inlined_call_operand.vmem [shape: f32[1,128], index: 2, kind: input, shape index: {}]   ;;  %s814_s3 = inlined_call_operand.hbm [shape: bf16[128,256], index: 3, kind: input, shape index: {}]   ;;  %s815_s4 = inlined_call_operand.vmem [shape: f32[1,256], index: 4, kind: input, shape index: {}]   ;;  %s816_s5 = inlined_call_operand.hbm [shape: bf16[256,128], index: 5, kind: input, shape index: {}]   ;;  %s817_s6 = inlined_call_operand.vmem [shape: f32[1,128], index: 6, kind: input, shape index: {}]   ;;  %s818_s7 = inlined_call_operand.hbm [shape: f32[8,128], index: 7, kind: output, shape index: {}]  }
   0x1   :  { %13 = vsyncpa [#allocation6], 0 }
   0x2   :  { %14 = vsyncpa [#allocation9], 0 }
   0x3   :  { %15 = vsyncpa [#allocation4], 0  ;;  %s729_s24 = smov [#allocation5]  }
   0x4   :  { %s31_s25 = sshll.u32 %s729_s24, 4  ;;  %s32_s25 = int_to_ptr.vmem [resolvable:$true] %s31_s25 }
   0x5   :  { %s629_s26 = scalar_lea.vmem %s32_s25, 256  ;;  %p634_p1 = scmp.lt.s32.totalorder %s32_s25, %s32_s25 }
   0x6   :  { %p630_p0 = scmp.ne.s32.totalorder %s32_s25, %s629_s26  ;;  %p635_p2 = scmp.lt.s32.totalorder %s629_s26, %s629_s26 }
   0x8   :  { %p636_p3 = por %p635_p2, %p634_p1 }
   0xa   :  { %p637_p4 = pnand %p636_p3, %p630_p0 }
   0xc   :  { %640 = shalt.err (!%p637_p4)
}
   0xd   :  { %s730_s27 = smov 64   ;;  %s731_s28 = smov 4  }
   0xe   :  { %37 = dma.hbm_to_vmem [thread:$0]  %s812_s1, 256, %s32_s25, [#allocation6], %s730_s27, %s730_s27, %s731_s28  }
   0xf   :  { %s732_s8 = smov [#allocation2]   ;;  %s733_s10 = smov [#allocation7]  }
  0x10   :  { %s22_s9 = sshll.u32 %s732_s8, 4  ;;  %s45_s11 = sshll.u32 %s733_s10, 4  ;;  %s23_s9 = int_to_ptr.vmem [resolvable:$true] %s22_s9  ;;  %s46_s11 = int_to_ptr.vmem [resolvable:$true] %s45_s11 }
  0x11   :  { %s649_s12 = scalar_lea.vmem %s23_s9, 64  ;;  %p654_p6 = scmp.lt.s32.totalorder %s23_s9, %s23_s9 }
  0x12   :  { %p650_p5 = scmp.ne.s32.totalorder %s23_s9, %s649_s12  ;;  %p655_p7 = scmp.lt.s32.totalorder %s649_s12, %s649_s12 }
  0x14   :  { %p656_p8 = por %p655_p7, %p654_p6 }
  0x16   :  { %p657_p9 = pnand %p656_p8, %p650_p5 }
  0x18   :  { %660 = shalt.err (!%p657_p9)
}
  0x19   :  { %25 = dma.hbm_to_vmem [thread:$0]  %s811_s0, 64, %s23_s9, [#allocation3]  }
  0x1a   :  { %s669_s15 = scalar_lea.vmem %s46_s11, 2048  ;;  %p674_p11 = scmp.lt.s32.totalorder %s46_s11, %s46_s11 }
  0x1b   :  { %p670_p10 = scmp.ne.s32.totalorder %s46_s11, %s669_s15  ;;  %p675_p12 = scmp.lt.s32.totalorder %s669_s15, %s669_s15 }
  0x1d   :  { %p676_p13 = por %p675_p12, %p674_p11 }
  0x1f   :  { %p677_p0 = pnand %p676_p13, %p670_p10 }
  0x21   :  { %680 = shalt.err (!%p677_p0)
}
  0x22   :  { %s734_s1 = smov 128   ;;  %s735_s16 = smov 8  }
  0x23   :  { %51 = dma.hbm_to_vmem [thread:$0]  %s814_s3, 2048, %s46_s11, [#allocation6], %s734_s1, %s734_s1, %s735_s16  }
  0x24   :  { %s736_s19 = smov [#allocation8]  }
  0x25   :  { %s59_s20 = sshll.u32 %s736_s19, 4  ;;  %s60_s20 = int_to_ptr.vmem [resolvable:$true] %s59_s20 }
  0x26   :  { %s689_s21 = scalar_lea.vmem %s60_s20, 2048  ;;  %p694_p2 = scmp.lt.s32.totalorder %s60_s20, %s60_s20 }
  0x27   :  { %p690_p1 = scmp.ne.s32.totalorder %s60_s20, %s689_s21  ;;  %p695_p3 = scmp.lt.s32.totalorder %s689_s21, %s689_s21 }
  0x29   :  { %p696_p4 = por %p695_p3, %p694_p2 }
  0x2b   :  { %p697_p5 = pnand %p696_p4, %p690_p1 }
  0x2d   :  { %700 = shalt.err (!%p697_p5)
}
  0x2e   :  { %65 = dma.hbm_to_vmem [thread:$0]  %s816_s5, 2048, %s60_s20, [#allocation9], %s730_s27, %s730_s27, %s731_s28  }
  0x2f   :  { %721 = dma.done.wait [#allocation3], 64  }
  0x30   :  { %722 = vsyncadd [#allocation3], 4294967232 }
  0x31   :  { %723 = dma.done.wait [#allocation6], 2304  }
  0x32   :  { %724 = vsyncadd [#allocation6], 4294964992 }
  0x33   :  { %725 = dma.done.wait [#allocation9], 2048  }
  0x34   :  { %726 = vsyncadd [#allocation9], 4294965248  ;;  %v737_v0 = vmov 0.0   ;;  %vm738_vm0 = vmmov 0   ;;  %v579_v1 = vld [vmem:[#allocation5 + $0x8] sm:$0xff]   ;;  %v580_v2 = vld [vmem:[#allocation5] sm:$0xff]   ;;  %v169_v45 = vlaneseq }
  0x35   :  { %559 = vmatprep.subr.bf16.mxu0 %v737_v0  ;;  %563 = vmatprep.mubr.msk.bf16.mxu0 %vm738_vm0, %v737_v0  ;;  %v581_v3 = vld [vmem:[#allocation7 + $0x74] ss:$8 sps:$4 sm:$0xff]   ;;  %v583_v4 = vld [vmem:[#allocation7 + $0x70] ss:$8 sps:$4 sm:$0xff]   ;;  %v584_v5 = vld [vmem:[#allocation7 + $0x64] ss:$8 sps:$4 sm:$0xff]  }
  0x36   :  { %560 = vmatpush3.bf16.msra.mxu0 %v579_v1  ;;  %v81_v6 = vld [vmem:[#allocation2] sm:$0xf]  ;;  %259 = vmatprep.subr.bf16.mxu1 %v581_v3  ;;  %vm105_vm1 = vcmask 261120   ;;  %v586_v7 = vld [vmem:[#allocation7 + $0x60] ss:$8 sps:$4 sm:$0xff]   ;;  %v739_v20 = vmov 0  }
  0x37   :  { %561 = vmatprep.subr.bf16.mxu0 %v737_v0  ;;  %260 = vmatpush1.bf16.msra.mxu1 %v583_v4  ;;  %v587_v8 = vld [vmem:[#allocation7 + $0x54] ss:$8 sps:$4 sm:$0xff]   ;;  %v589_v9 = vld [vmem:[#allocation7 + $0x50] ss:$8 sps:$4 sm:$0xff]   ;;  %v590_v10 = vld [vmem:[#allocation7 + $0x44] ss:$8 sps:$4 sm:$0xff]  }
  0x38   :  { %261 = vmatprep.subr.bf16.mxu1 %v584_v5  ;;  %v592_v11 = vld [vmem:[#allocation7 + $0x40] ss:$8 sps:$4 sm:$0xff]   ;;  %v593_v12 = vld [vmem:[#allocation7 + $0x34] ss:$8 sps:$4 sm:$0xff]   ;;  %v595_v13 = vld [vmem:[#allocation7 + $0x30] ss:$8 sps:$4 sm:$0xff]   ;;  %291 = vmatprep.mubr.bf16.mxu1 %v739_v20 }
  0x39   :  { %v596_v14 = vld [vmem:[#allocation7 + $0x24] ss:$8 sps:$4 sm:$0xff]   ;;  %v598_v15 = vld [vmem:[#allocation7 + $0x20] ss:$8 sps:$4 sm:$0xff]   ;;  %v599_v16 = vld [vmem:[#allocation7 + $0x14] ss:$8 sps:$4 sm:$0xff]  }
  0x3a   :  { %562 = vmatpush3.bf16.msra.mxu0 %v580_v2  ;;  %v601_v17 = vld [vmem:[#allocation7 + $0x10] ss:$8 sps:$4 sm:$0xff]   ;;  %v602_v18 = vld [vmem:[#allocation7 + $0x4] ss:$8 sps:$4 sm:$0xff]   ;;  %v604_v19 = vld [vmem:[#allocation7] ss:$8 sps:$4 sm:$0xff]  }
  0x3b   :  { %262 = vmatpush1.bf16.msra.mxu1 %v586_v7  ;;  %v605_v21 = vld [vmem:[#allocation8 + $0x78] sm:$0xff]   ;;  %v607_v23 = vld [vmem:[#allocation8 + $0x70] sm:$0xff]   ;;  %v609_v25 = vld [vmem:[#allocation8 + $0x68] sm:$0xff]   ;;  %v170_v46 = vshrl.u32 %v169_v45, 7 }
  0x3c   :  { %263 = vmatprep.subr.bf16.mxu1 %v587_v8  ;;  %v606_v22 = vld [vmem:[#allocation8 + $0x38] sm:$0xff]   ;;  %537 = vmatprep.subr.bf16.mxu0 %v605_v21  ;;  %v608_v24 = vld [vmem:[#allocation8 + $0x30] sm:$0xff]   ;;  %v610_v26 = vld [vmem:[#allocation8 + $0x28] sm:$0xff]  }
  0x3d   :  { %564 = vmatmul.mubr.msk.bf16.vlgmr.msra.gmra.mxu0 %vm105_vm1, %v81_v6  ;;  %v611_v27 = vld [vmem:[#allocation8 + $0x60] sm:$0xff]   ;;  %v613_v29 = vld [vmem:[#allocation8 + $0x58] sm:$0xff]   ;;  %v615_v31 = vld [vmem:[#allocation8 + $0x50] sm:$0xff]   ;;  %v171_v47 = vsub.s32 0, %v170_v46  ;;  %v175_v49 = vsub.s32 1, %v170_v46 }
  0x3e   :  { %538 = vmatpush3.bf16.msra.mxu0 %v606_v22  ;;  %v612_v28 = vld [vmem:[#allocation8 + $0x20] sm:$0xff]   ;;  %v614_v30 = vld [vmem:[#allocation8 + $0x18] sm:$0xff]   ;;  %v616_v32 = vld [vmem:[#allocation8 + $0x10] sm:$0xff]  }
  0x3f   :  { %264 = vmatpush1.bf16.msra.mxu1 %v589_v9  ;;  %539 = vmatprep.subr.bf16.mxu0 %v607_v23  ;;  %v497_v33 = vld [vmem:[%s813_s2] ss:$0 sm:$0xff]  ;;  %v619_v43 = vld [vmem:[#allocation8 + $0x40] sm:$0xff]  }
  0x40   :  { %265 = vmatprep.subr.bf16.mxu1 %v590_v10  ;;  %v617_v41 = vld [vmem:[#allocation8 + $0x48] sm:$0xff]   ;;  %v620_v44 = vld [vmem:[#allocation8] sm:$0xff]  }
  0x41   :  { %v618_v42 = vld [vmem:[#allocation8 + $0x8] sm:$0xff]  }
  0x42   :  { %540 = vmatpush3.bf16.msra.mxu0 %v608_v24  ;;  %v167_v48 = vld [vmem:[%s815_s4] sm:$0x3]  ;;  %s740_s4 = smov [#allocation10]  }
  0x43   :  { %266 = vmatpush1.bf16.msra.mxu1 %v592_v11  ;;  %541 = vmatprep.subr.bf16.mxu0 %v609_v25  ;;  %v172_v50 = vrot.slane %v167_v48, %v171_v47  ;;  %v176_v51 = vrot.slane %v167_v48, %v175_v49  ;;  %v517_v63 = vld [vmem:[%s817_s6] ss:$0 sm:$0xff]  ;;  %s486_s26 = sshll.u32 %s740_s4, 4  ;;  %s487_s26 = int_to_ptr.vmem [resolvable:$true] %s486_s26 }
  0x44   :  { %267 = vmatprep.subr.bf16.mxu1 %v593_v12  ;;  %s701_s27 = scalar_lea.vmem %s487_s26, 128  ;;  %p706_p7 = scmp.lt.s32.totalorder %s487_s26, %s487_s26 }
  0x45   :  { %p702_p6 = scmp.ne.s32.totalorder %s487_s26, %s701_s27  ;;  %p707_p8 = scmp.lt.s32.totalorder %s701_s27, %s701_s27 }
  0x46   :  { %542 = vmatpush3.bf16.msra.mxu0 %v610_v26 }
  0x47   :  { %268 = vmatpush1.bf16.msra.mxu1 %v595_v13  ;;  %543 = vmatprep.subr.bf16.mxu0 %v611_v27  ;;  %p708_p9 = por %p707_p8, %p706_p7 }
  0x48   :  { %269 = vmatprep.subr.bf16.mxu1 %v596_v14 }
  0x49   :  { %p709_p10 = pnand %p708_p9, %p702_p6 }
  0x4a   :  { %544 = vmatpush3.bf16.msra.mxu0 %v612_v28 }
  0x4b   :  { %270 = vmatpush1.bf16.msra.mxu1 %v598_v15  ;;  %545 = vmatprep.subr.bf16.mxu0 %v613_v29 }
  0x4c   :  { %271 = vmatprep.subr.bf16.mxu1 %v599_v16 }
  0x4e   :  { %546 = vmatpush3.bf16.msra.mxu0 %v614_v30 }
  0x4f   :  { %272 = vmatpush1.bf16.msra.mxu1 %v601_v17  ;;  %547 = vmatprep.subr.bf16.mxu0 %v615_v31 }
  0x50   :  { %273 = vmatprep.subr.bf16.mxu1 %v602_v18 }
  0x52   :  { %548 = vmatpush3.bf16.msra.mxu0 %v616_v32 }
  0x53   :  { %274 = vmatpush1.bf16.msra.mxu1 %v604_v19  ;;  %549 = vmatprep.subr.bf16.mxu0 %v617_v41 }
  0x56   :  { %550 = vmatpush3.bf16.msra.mxu0 %v618_v42 }
  0x57   :  { %551 = vmatprep.subr.bf16.mxu0 %v619_v43 }
  0x5a   :  { %552 = vmatpush3.bf16.msra.mxu0 %v620_v44 }
  0xfd   :  { %v143_v34 = vpop.f32.mrf.mxu0 }
  0xfe   :  { %v144_v35 = vadd.f32 %v497_v33, %v143_v34 }
  0xff   :  { %v565_v36 = vpop.f32.mrf.mxu0 }
 0x100   :  { %v149_v37 = vmax.f32 %v144_v35, 0.0 }
 0x101   :  { %v146_v38 = vpop.f32.mrf.mxu0 }
 0x102   :  { %v150_v39 = vpack.c.bf16 %v149_v37, %v149_v37 }
 0x103   :  { %v566_v40 = vpop.f32.mrf.mxu0 }
 0x104   :  { %292 = vmatmul.mubr.bf16.vlgmr.msra.gmra.mxu1 %v150_v39 }
 0x1c4   :  { %v293_v52 = vpop.f32.mrf.mxu1 }
 0x1c5   :  { %v294_v53 = vadd.f32 %v293_v52, %v172_v50 }
 0x1c6   :  { %v295_v54 = vpop.f32.mrf.mxu1 }
 0x1c7   :  { %v296_v55 = vadd.f32 %v295_v54, %v176_v51  ;;  %v300_v56 = vmax.f32 %v294_v53, 0.0 }
 0x1c8   :  { %v297_v57 = vpop.f32.mrf.mxu1 }
 0x1c9   :  { %v301_v58 = vmax.f32 %v296_v55, 0.0  ;;  %v302_v61 = vpack.c.bf16 %v300_v56, %v300_v56 }
 0x1ca   :  { %v298_v59 = vpop.f32.mrf.mxu1 }
 0x1cb   :  { %v303_v60 = vpack.c.bf16 %v301_v58, %v301_v58 }
 0x1cd   :  { %471 = vmatprep.mubr.bf16.mxu0 %v303_v60 }
 0x1ce   :  { %472 = vmatmul.mubr.bf16.vlgmr.msra.gmra.mxu0 %v302_v61 }
 0x28e   :  { %v553_v62 = vpop.f32.mrf.mxu0 }
 0x290   :  { %v554_v0 = vpop.f32.mrf.mxu0 }
 0x291   :  { %v555_v1 = vadd.f32 %v554_v0, %v553_v62 }
 0x292   :  { %v556_v2 = vpop.f32.mrf.mxu0 }
 0x293   :  { %v474_v3 = vadd.f32 %v555_v1, %v517_v63 }
 0x294   :  { %v557_v4 = vpop.f32.mrf.mxu0 }
 0x295   :  { %479 = vst [vmem:[#allocation10] sm:$0xff] %v474_v3 }
 0x296   :  { %712 = shalt.err (!%p709_p10)
}
 0x297   :  { %489 = dma.vmem_to_hbm [thread:$0]  %s487_s26, 128, %s818_s7, [#allocation4]  }
 0x298   :  { %727 = dma.done.wait [#allocation4], 128  }
 0x299   :  { %728 = vsyncadd [#allocation4], 4294967168 }
 0x29a   :  { %493 = vsyncpa [#allocation3], 1 }
 0x29b   :  { %494 = vsyncpa [#allocation6], 1 }
 0x29c   :  { %495 = vsyncpa [#allocation9], 1 }
 0x29d   :  { %496 = vsyncpa [#allocation4], 1 }

</bundles_post_ra>
